<compile_context>
chip_gen: v7x
topology: tpu7x:2x2x1
jax: 0.10.0
libtpu: 0.0.40
codegen_flags: <defaults>
</compile_context>

<pallas_src>
import numpy as np
import jax
import jax.numpy as jnp
from jax import lax
from jax.experimental import pallas as pl
from jax.experimental.pallas import tpu as pltpu


# -----------------------------------------------------------------------------------------
# Host-side construction of the folded pad+blur+subsample matrices (tiny, trace-time only).
# -----------------------------------------------------------------------------------------
def _gaussian_1d(scale):
    """1-D Gaussian taps; outer(g, g) equals the module's normalized 2-D kernel."""
    sigma = (1.0 / scale - 1.0) / 2.0
    ks = 2 * round(sigma * 4) + 1          # always odd -> ka == kb
    ka = ks // 2
    mean = (ks - 1) / 2.0
    t = np.arange(ks, dtype=np.float64)
    g = np.exp(-((t - mean) ** 2) / (2.0 * sigma ** 2))
    return (g / g.sum()), ks, ka


def _downsample_matrix(size, scale):
    """(size, out) matrix A so that (zero-pad -> K-tap blur -> [::s]) == x @ A on that axis."""
    g, ks, ka = _gaussian_1d(scale)
    # NOTE: mirrors the module's int() truncation of 1/scale (int_inv_scale). Do not "fix".
    s = int(1.0 / scale)
    out = -(-size // s)                    # ceil(size / s) == len(range(size)[::s])
    a = np.zeros((size, out), np.float32)
    for o in range(out):
        for k in range(ks):
            m = o * s + k - ka             # source index in the *unpadded* signal
            if 0 <= m < size:              # taps landing in the zero padding vanish
                a[m, o] += g[k]
    return a


def _ceil_to(v, m):
    return -(-v // m) * m


# -----------------------------------------------------------------------------------------
# Per-generation sizing heuristics.
# -----------------------------------------------------------------------------------------
def _tpu_caps():
    kind = ""
    try:
        kind = jax.devices()[0].device_kind.lower()
    except Exception:
        pass
    if "v7" in kind:                                  # 64 MiB VMEM, 2 TCs, most DMA-bound
        return dict(block_budget=4 << 20, vmem_cap=48 << 20, cores=2)
    if "v5p" in kind or "v4" in kind:                 # megacore, 128 MiB VMEM
        return dict(block_budget=8 << 20, vmem_cap=64 << 20, cores=2)
    if "v5" in kind or "v6" in kind:                  # v5e / v6e: single TC, 128 MiB VMEM
        return dict(block_budget=8 << 20, vmem_cap=64 << 20, cores=1)
    return dict(block_budget=4 << 20, vmem_cap=48 << 20, cores=2)   # conservative default


def _choose_plane_block(nc, plane_in_bytes, budget_bytes, num_cores, max_unroll=32):
    """Pick planes-per-step so the input block is ~budget bytes; prefer balanced grids."""
    byte_cap = max(1, budget_bytes // max(plane_in_bytes, 1))
    cap = max(1, min(nc, byte_cap, max_unroll))
    if cap >= nc:
        # Whole NC fits in one step's budget.
        if num_cores > 1 and nc >= num_cores and nc % num_cores == 0:
            return nc // num_cores          # one balanced step per TensorCore
        return nc                           # single step: no grid-loop overhead (1-TC chips)
    divisors = [d for d in range(1, cap + 1) if nc % d == 0]
    balanced = [d for d in divisors if (nc // d) % num_cores == 0]
    return max(balanced) if balanced else max(divisors)


# -----------------------------------------------------------------------------------------
# Pallas kernels: one grid step processes a block of PB (n, c) planes.
# -----------------------------------------------------------------------------------------
def _make_fused_kernel(pb, ho):
    # Fast path (Ho % 8 == 0): scratch slices stay sublane-tile aligned and the output is a
    # single lane/sublane-dense slab store.
    def kernel(x_ref, aht_ref, aw_ref, out_ref, z_ref):
        # x_ref   : (PB, H, W)     block of input planes
        # aht_ref : (Ho, H)        vertical   pad+blur+subsample matrix (pre-transposed)
        # aw_ref  : (W,  Wo)       horizontal pad+blur+subsample matrix
        # out_ref : (PB*Ho, Wo)
        # z_ref   : (PB*Ho, W) f32 VMEM scratch (lane-dense intermediate)
        aht = aht_ref[...]
        # Vertical pass: PB small matmuls with N = W (full MXU lane fill).
        for p in range(pb):
            z_ref[pl.ds(p * ho, ho), :] = jnp.dot(
                aht, x_ref[p], preferred_element_type=jnp.float32)
        # Horizontal pass: ONE fused (PB*Ho, W) @ (W, Wo) matmul + ONE contiguous store.
        out_ref[...] = jnp.dot(
            z_ref[...], aw_ref[...],
            preferred_element_type=jnp.float32).astype(out_ref.dtype)
    return kernel


def _make_fallback_kernel(pb):
    # Safe path for odd shapes (Ho % 8 != 0): avoids any tile-boundary reshape/scratch
    # alignment issues; still does the lane-dense vertical pass first.
    def kernel(x_ref, aht_ref, aw_ref, out_ref):
        # out_ref : (PB, Ho, Wo)
        aht = aht_ref[...]
        aw = aw_ref[...]
        for p in range(pb):
            zp = jnp.dot(aht, x_ref[p], preferred_element_type=jnp.float32)   # (Ho, W)
            out_ref[p] = jnp.dot(zp, aw,
                                 preferred_element_type=jnp.float32).astype(out_ref.dtype)
    return kernel


# -----------------------------------------------------------------------------------------
# Wrapper: NCHW in, NCHW out (only free reshapes outside the kernel).
# -----------------------------------------------------------------------------------------
def anti_alias_interpolation2d(x, scale):
    if scale == 1.0:
        return x                            # module semantics: identity at scale 1

    n, c, h, w = x.shape
    a_w = _downsample_matrix(w, scale)                           # (W,  Wo)
    a_ht = np.ascontiguousarray(_downsample_matrix(h, scale).T)  # (Ho, H)
    wo = a_w.shape[1]
    ho = a_ht.shape[0]
    nc = n * c
    itemsize = jnp.dtype(x.dtype).itemsize

    caps = _tpu_caps()
    # Padded (sublane 8 / lane 128) bytes of one input plane as seen in VMEM.
    plane_in_bytes = _ceil_to(h, 8) * _ceil_to(w, 128) * itemsize
    pb = _choose_plane_block(nc, plane_in_bytes, caps["block_budget"], caps["cores"])
    grid = (nc // pb,)
    fused = (ho % 8) == 0

    # VMEM budget: double-buffered input/output blocks + weights + f32 intermediate.
    in_blk = pb * plane_in_bytes
    out_blk = _ceil_to(pb * ho, 8) * _ceil_to(wo, 128) * itemsize
    z_blk = _ceil_to(pb * ho, 8) * _ceil_to(w, 128) * 4 if fused else 0
    wgt = (_ceil_to(ho, 8) * _ceil_to(h, 128) + _ceil_to(w, 8) * _ceil_to(wo, 128)) * 4
    needed = 2 * in_blk + 2 * out_blk + 2 * wgt + z_blk + (2 << 20)
    vmem_limit = int(min(caps["vmem_cap"], max(32 << 20, needed)))
    # TODO(synk): a single (h, w) plane larger than the VMEM budget would require spatial
    # tiling of the folded matmuls; not implemented (not needed for typical image sizes).

    xr = x.reshape(nc, h, w)                # metadata-only reshape, no data movement
    aht_j = jnp.asarray(a_ht)
    aw_j = jnp.asarray(a_w)

    in_specs = [
        pl.BlockSpec((pb, h, w), lambda i: (i, 0, 0)),
        pl.BlockSpec((ho, h), lambda i: (0, 0)),
        pl.BlockSpec((w, wo), lambda i: (0, 0)),
    ]
    compiler_params = pltpu.CompilerParams(
        dimension_semantics=("parallel",),
        vmem_limit_bytes=vmem_limit,
    )

    if fused:
        out = pl.pallas_call(
            _make_fused_kernel(pb, ho),
            out_shape=jax.ShapeDtypeStruct((nc * ho, wo), x.dtype),
            grid=grid,
            in_specs=in_specs,
            out_specs=pl.BlockSpec((pb * ho, wo), lambda i: (i, 0)),
            scratch_shapes=[pltpu.VMEM((pb * ho, w), jnp.float32)],
            compiler_params=compiler_params,
        )(xr, aht_j, aw_j)
    else:
        out = pl.pallas_call(
            _make_fallback_kernel(pb),
            out_shape=jax.ShapeDtypeStruct((nc, ho, wo), x.dtype),
            grid=grid,
            in_specs=in_specs,
            out_specs=pl.BlockSpec((pb, ho, wo), lambda i: (i, 0, 0)),
            compiler_params=compiler_params,
        )(xr, aht_j, aw_j)

    return out.reshape(n, c, ho, wo)


# -----------------------------------------------------------------------------------------
# Pure-JAX reference mirroring the PyTorch module (explicit pad, 2-D depthwise conv, [::s]).
# -----------------------------------------------------------------------------------------
def _ref_anti_alias(x, scale):
    if scale == 1.0:
        return x
    g, ks, ka = _gaussian_1d(scale)
    kb = ka                                              # kernel_size is always odd
    k2d = np.outer(g, g).astype(np.float32)              # == torch kernel / kernel.sum()
    c = x.shape[1]
    wgt = jnp.asarray(np.broadcast_to(k2d, (c, 1, ks, ks)).copy())
    xp = jnp.pad(x, ((0, 0), (0, 0), (ka, kb), (ka, kb)))
    y = lax.conv_general_dilated(
        xp, wgt, window_strides=(1, 1), padding='VALID',
        feature_group_count=c,
        dimension_numbers=('NCHW', 'OIHW', 'NCHW'),
        precision=lax.Precision.HIGHEST)
    s = int(1.0 / scale)
    return y[:, :, ::s, ::s]


if __name__ == "__main__":
    key = jax.random.PRNGKey(0)
    x = jax.random.normal(key, (2, 4, 16, 16), jnp.float32)   # NCHW, as in PyTorch

    fwd = jax.jit(anti_alias_interpolation2d, static_argnums=(1,))

    # scale=0.5 -> 5x5 kernel, stride 2 (fused path); scale=0.25 -> 13x13 kernel, stride 4
    # (fallback path, Ho=4); scale=1 -> identity.
    for scale in (0.5, 0.25, 1.0):
        out = jax.block_until_ready(fwd(x, scale))
        ref = jax.block_until_ready(_ref_anti_alias(x, scale))
        np.testing.assert_allclose(np.asarray(out), np.asarray(ref), rtol=1e-3, atol=1e-4)

    print("KERNEL_OK")
</pallas_src>

<mosaic_0001>
module attributes {stable_mosaic.version = 11 : i64} {
  func.func @kernel(%arg0: i32, %arg1: memref<4x16x16xf32, #tpu.memory_space<vmem>>, %arg2: memref<8x16xf32, #tpu.memory_space<vmem>>, %arg3: memref<16x8xf32, #tpu.memory_space<vmem>>, %arg4: memref<32x8xf32, #tpu.memory_space<vmem>>, %arg5: memref<32x16xf32, #tpu.memory_space<vmem>>) attributes {dimension_semantics = [#tpu.dimension_semantics<parallel>], iteration_bounds = array<i64: 2>, scalar_prefetch = 0 : i64, scratch_operands = 1 : i64, tpu.core_type = #tpu.core_type<tc>, window_params = [{transform_indices = @transform_0, window_bounds = array<i64: 4, 16, 16>}, {pipeline_mode = #tpu.pipeline_mode<synchronous>, transform_indices = @transform_1, window_bounds = array<i64: 8, 16>}, {pipeline_mode = #tpu.pipeline_mode<synchronous>, transform_indices = @transform_2, window_bounds = array<i64: 16, 8>}, {transform_indices = @transform_3, window_bounds = array<i64: 32, 8>}]} {
    %c0 = arith.constant 0 : index
    %c0_0 = arith.constant 0 : index
    %0 = vector.load %arg2[%c0, %c0_0] : memref<8x16xf32, #tpu.memory_space<vmem>>, vector<8x16xf32>
    %c0_1 = arith.constant 0 : index
    %c0_2 = arith.constant 0 : index
    %c0_3 = arith.constant 0 : index
    %1 = vector.load %arg1[%c0_1, %c0_2, %c0_3] : memref<4x16x16xf32, #tpu.memory_space<vmem>>, vector<1x16x16xf32>
    %2 = vector.shape_cast %1 : vector<1x16x16xf32> to vector<16x16xf32>
    %cst = arith.constant dense<0.000000e+00> : vector<8x16xf32>
    %3 = tpu.matmul %0, %2, %cst {dimension_numbers = #tpu.dot_dimension_numbers<[1], [0], [0], [1], [0, 0, 1, 1], [], []>} : vector<8x16xf32>, vector<16x16xf32>, vector<8x16xf32> -> vector<8x16xf32>
    %c0_4 = arith.constant 0 : index
    %c0_5 = arith.constant 0 : index
    %4 = vector.load %arg5[%c0_4, %c0_5] : memref<32x16xf32, #tpu.memory_space<vmem>>, vector<8x16xf32>
    tpu.vector_store %arg5[%c0_4, %c0_5], %3 {strides = array<i32>} : memref<32x16xf32, #tpu.memory_space<vmem>>, vector<8x16xf32>,
    %c1 = arith.constant 1 : index
    %c0_6 = arith.constant 0 : index
    %c0_7 = arith.constant 0 : index
    %5 = vector.load %arg1[%c1, %c0_6, %c0_7] : memref<4x16x16xf32, #tpu.memory_space<vmem>>, vector<1x16x16xf32>
    %6 = vector.shape_cast %5 : vector<1x16x16xf32> to vector<16x16xf32>
    %cst_8 = arith.constant dense<0.000000e+00> : vector<8x16xf32>
    %7 = tpu.matmul %0, %6, %cst_8 {dimension_numbers = #tpu.dot_dimension_numbers<[1], [0], [0], [1], [0, 0, 1, 1], [], []>} : vector<8x16xf32>, vector<16x16xf32>, vector<8x16xf32> -> vector<8x16xf32>
    %c8 = arith.constant 8 : index
    %c0_9 = arith.constant 0 : index
    %8 = vector.load %arg5[%c8, %c0_9] : memref<32x16xf32, #tpu.memory_space<vmem>>, vector<8x16xf32>
    tpu.vector_store %arg5[%c8, %c0_9], %7 {strides = array<i32>} : memref<32x16xf32, #tpu.memory_space<vmem>>, vector<8x16xf32>,
    %c2 = arith.constant 2 : index
    %c0_10 = arith.constant 0 : index
    %c0_11 = arith.constant 0 : index
    %9 = vector.load %arg1[%c2, %c0_10, %c0_11] : memref<4x16x16xf32, #tpu.memory_space<vmem>>, vector<1x16x16xf32>
    %10 = vector.shape_cast %9 : vector<1x16x16xf32> to vector<16x16xf32>
    %cst_12 = arith.constant dense<0.000000e+00> : vector<8x16xf32>
    %11 = tpu.matmul %0, %10, %cst_12 {dimension_numbers = #tpu.dot_dimension_numbers<[1], [0], [0], [1], [0, 0, 1, 1], [], []>} : vector<8x16xf32>, vector<16x16xf32>, vector<8x16xf32> -> vector<8x16xf32>
    %c16 = arith.constant 16 : index
    %c0_13 = arith.constant 0 : index
    %12 = vector.load %arg5[%c16, %c0_13] : memref<32x16xf32, #tpu.memory_space<vmem>>, vector<8x16xf32>
    tpu.vector_store %arg5[%c16, %c0_13], %11 {strides = array<i32>} : memref<32x16xf32, #tpu.memory_space<vmem>>, vector<8x16xf32>,
    %c3 = arith.constant 3 : index
    %c0_14 = arith.constant 0 : index
    %c0_15 = arith.constant 0 : index
    %13 = vector.load %arg1[%c3, %c0_14, %c0_15] : memref<4x16x16xf32, #tpu.memory_space<vmem>>, vector<1x16x16xf32>
    %14 = vector.shape_cast %13 : vector<1x16x16xf32> to vector<16x16xf32>
    %cst_16 = arith.constant dense<0.000000e+00> : vector<8x16xf32>
    %15 = tpu.matmul %0, %14, %cst_16 {dimension_numbers = #tpu.dot_dimension_numbers<[1], [0], [0], [1], [0, 0, 1, 1], [], []>} : vector<8x16xf32>, vector<16x16xf32>, vector<8x16xf32> -> vector<8x16xf32>
    %c24 = arith.constant 24 : index
    %c0_17 = arith.constant 0 : index
    %16 = vector.load %arg5[%c24, %c0_17] : memref<32x16xf32, #tpu.memory_space<vmem>>, vector<8x16xf32>
    tpu.vector_store %arg5[%c24, %c0_17], %15 {strides = array<i32>} : memref<32x16xf32, #tpu.memory_space<vmem>>, vector<8x16xf32>,
    %c0_18 = arith.constant 0 : index
    %c0_19 = arith.constant 0 : index
    %17 = vector.load %arg5[%c0_18, %c0_19] : memref<32x16xf32, #tpu.memory_space<vmem>>, vector<32x16xf32>
    %c0_20 = arith.constant 0 : index
    %c0_21 = arith.constant 0 : index
    %18 = vector.load %arg3[%c0_20, %c0_21] : memref<16x8xf32, #tpu.memory_space<vmem>>, vector<16x8xf32>
    %cst_22 = arith.constant dense<0.000000e+00> : vector<32x8xf32>
    %19 = tpu.matmul %17, %18, %cst_22 {dimension_numbers = #tpu.dot_dimension_numbers<[1], [0], [0], [1], [0, 0, 1, 1], [], []>} : vector<32x16xf32>, vector<16x8xf32>, vector<32x8xf32> -> vector<32x8xf32>
    %c0_23 = arith.constant 0 : index
    %c0_24 = arith.constant 0 : index
    %20 = vector.load %arg4[%c0_23, %c0_24] : memref<32x8xf32, #tpu.memory_space<vmem>>, vector<32x8xf32>
    tpu.vector_store %arg4[%c0_23, %c0_24], %19 {strides = array<i32>} : memref<32x8xf32, #tpu.memory_space<vmem>>, vector<32x8xf32>,
    return
  }
  func.func @transform_0(%arg0: i32) -> (i32, i32, i32) {
    %c0_i32 = arith.constant 0 : i32
    %c0_i32_0 = arith.constant 0 : i32
    %c0_i32_1 = arith.constant 0 : i32
    return %arg0, %c0_i32, %c0_i32_0 : i32, i32, i32
  }
  func.func @transform_1(%arg0: i32) -> (i32, i32) {
    %c0_i32 = arith.constant 0 : i32
    %c0_i32_0 = arith.constant 0 : i32
    %c0_i32_1 = arith.constant 0 : i32
    return %c0_i32, %c0_i32_0 : i32, i32
  }
  func.func @transform_2(%arg0: i32) -> (i32, i32) {
    %c0_i32 = arith.constant 0 : i32
    %c0_i32_0 = arith.constant 0 : i32
    %c0_i32_1 = arith.constant 0 : i32
    return %c0_i32, %c0_i32_0 : i32, i32
  }
  func.func @transform_3(%arg0: i32) -> (i32, i32) {
    %c0_i32 = arith.constant 0 : i32
    %c0_i32_0 = arith.constant 0 : i32
    return %arg0, %c0_i32 : i32, i32
  }
}

</mosaic_0001>

<bundles_post_ra>
// kernel: anti_alias_interpolation2d.1
= control target key start
LH: loop header
LB: loop body
LE: loop exit
PB: predicated region body
PF: predicated region fallthrough
CT: control target
= control target key end

     0   :  { %8 = vsyncpa [#allocation4], 0  ;;  %s1358_s0 = inlined_call_operand.hbm [shape: f32[8,16,16], index: 0, kind: input, shape index: {}]   ;;  %s1359_s1 = inlined_call_operand.hbm [shape: f32[8,16], index: 1, kind: input, shape index: {}]   ;;  %s1360_s2 = inlined_call_operand.hbm [shape: f32[16,8], index: 2, kind: input, shape index: {}]   ;;  %s1361_s3 = inlined_call_operand.hbm [shape: f32[64,8], index: 3, kind: output, shape index: {}]  }
   0x1   :  { %10 = vsyncpa [#allocation4 + $0x1], 0 }
   0x2   :  { %11 = vsyncpa [#allocation7], 0 }
   0x3   :  { %12 = vsyncpa [#allocation5], 0 }
   0x4   :  { %14 = vsyncpa [#allocation5 + $0x1], 0  ;;  %s1104_s12 = smov 0   ;;  %s1106_s13 = smov 0  }
   0x5   :  { %s1108_s14 = smov 0   ;;  %s1110_s15 = smov 0  }
   0x6 LB: > { %s1125_s16 = sadd.s32 4294967295, %s1071_s15   ;;  %s733_s17 = sadd.s32 4294967294, %s1071_s15   ;;  %s1071_s15 = sphi %s1110_s15, %s1386_s15   ;;  %s1067_s14 = sphi %s1108_s14, %s1385_s14   ;;  %s1063_s13 = sphi %s1106_s13, %s1384_s13   ;;  %s1059_s12 = sphi %s1104_s12, %s1383_s12  }
   0x7   : > { %s1129_s18 = sadd.s32 1, %s1071_s15   ;;  %s27_s19 = sadd.s32 1, %s1067_s14 }
   0x8   : > { %s24_s20 = ssub.s32 %s1071_s15, %s1129_s18  ;;  %p34_p0 = scmp.ne.s32.totalorder %s1067_s14, %s1063_s13 }
   0x9   : > { %p25_p1 = scmp.eq.s32.totalorder %s24_s20, 0  ;;  %p35_p2 = scmp.eq.s32.totalorder %s1071_s15, 0 }
   0xa   : > { %p40_p3 = scmp.ne.s32.totalorder %s1063_s13, %s1059_s12  ;;  %p1362_p4 = scmp.eq.s32.totalorder %s1125_s16, 0 }
   0xb   : > { %s1141_s21 = scalar_select %p25_p1, %s1067_s14, %s27_s19  }
   0xc   : > { %p1143_p5 = por %p35_p2, %p34_p0  ;;  %p1149_p6 = por %p1362_p4, %p40_p3 }
   0xd   : > { %p106_p7 = scmp.eq.s32.totalorder %s1125_s16, 1  ;;  %p112_p8 = scmp.eq.s32.totalorder %s733_s17, 1 }
   0xe   : > { %s1368_s23 = scalar_select %p1149_p6, 1, 0 }
   0xf   : > { %p734_p9 = scmp.ge.s32.totalorder %s1071_s15, 1  ;;  %p119_p10 = scmp.lt.s32.totalorder %s1071_s15, 3 }
  0x10   : > { %p1156_p11 = por %p106_p7, %p34_p0  ;;  %p1160_p12 = por %p112_p8, %p40_p3 }
  0x11   : > { %p1164_p13 = pnand %p734_p9, %p119_p10  ;;  %s1073_s27 = smov [#allocation6]  }
  0x12   : > { %s1369_s24 = scalar_select %p1156_p11, 1, 0 }
  0x13   : > { %s1370_s25 = scalar_select %p1160_p12, 1, 0 }
  0x14   : > { %s1371_s26 = scalar_select %p1164_p13, 1, 0 }
  0x15   : > { %p853_p2 = pneg %p1164_p13  ;;  %s132_s28 = sshll.u32 %s1073_s27, 4  ;;  %s133_s28 = int_to_ptr.vmem [resolvable:$true] %s132_s28 }
  0x16   : > { %p870_p4 = scmp.lt.s32.totalorder %s1071_s15, 2  ;;  %p1372_p0 = scmp.eq.s32.totalorder %s1125_s16, 0 }
  0x17   : > { %s1074_s4 = smov [#allocation8]   ;;  %s915_s8 = scalar_lea.hbm %s1359_s1, 128 }
  0x18   : > { %p1174_p7 = pnand %p853_p2, %p1372_p0  ;;  %p1180_p3 = pnand %p870_p4, %p1143_p5 }
  0x19   : > { %s142_s5 = sshll.u32 %s1074_s4, 4  ;;  %p916_p8 = scmp.ne.s32.totalorder %s1359_s1, %s915_s8  ;;  %s1184_s5 = int_to_ptr.vmem [resolvable:$true] %s142_s5 }
  0x1a   : > { %s1374_s30 = scalar_select %p1180_p3, 1, 0 }
  0x1b   : > { %p917_p9 = pneg %p1174_p7  ;;  %p922_p10 = scmp.lt.u32.totalorder %s915_s8, %s1359_s1 }
  0x1d   : > { %p918_p4 = pnand %p917_p9, %p916_p8 }
  0x1f   : > { %p919_p5 = pneg %p918_p4 }
  0x21   : > { %p924_p2 = pnand %p922_p10, %p919_p5 }
  0x23   : > { %927 = shalt.err (!%p924_p2)
}
  0x24   : > { %s928_s19 = scalar_lea.vmem %s133_s28, 128  ;;  %p936_p11 = scmp.lt.s32.totalorder %s133_s28, %s133_s28 }
  0x25   : > { %p929_p0 = scmp.ne.s32.totalorder %s133_s28, %s928_s19  ;;  %p937_p6 = scmp.lt.s32.totalorder %s928_s19, %s928_s19 }
  0x27   : > { %p931_p1 = pnand %p929_p0, %p917_p9  ;;  %p938_p13 = por %p937_p6, %p936_p11 }
  0x29   : > { %p932_p12 = pneg %p931_p1 }
  0x2b   : > { %p939_p3 = pnand %p938_p13, %p932_p12 }
  0x2d   : > { %942 = shalt.err (!%p939_p3)
}
  0x2e   : > { %856 = dma.hbm_to_vmem [thread:$0]  (!%p1174_p7), %s1359_s1, 128, %s133_s28, [#allocation7]  }
  0x2f   : > { %s156_s27 = sand.u32 1, %s1067_s14   ;;  %s943_s7 = scalar_lea.hbm %s1360_s2, 256 }
  0x30   : > { %p944_p1 = scmp.ne.s32.totalorder %s1360_s2, %s943_s7  ;;  %p950_p12 = scmp.lt.u32.totalorder %s943_s7, %s1360_s2 }
  0x32   : > { %p946_p6 = pnand %p944_p1, %p917_p9 }
  0x34   : > { %p947_p11 = pneg %p946_p6 }
  0x36   : > { %p952_p13 = pnand %p950_p12, %p947_p11 }
  0x38   : > { %955 = shalt.err (!%p952_p13)
}
  0x39   : > { %s956_s28 = scalar_lea.vmem %s1184_s5, 256  ;;  %p964_p5 = scmp.lt.s32.totalorder %s1184_s5, %s1184_s5 }
  0x3a   : > { %p957_p3 = scmp.ne.s32.totalorder %s1184_s5, %s956_s28  ;;  %p965_p10 = scmp.lt.s32.totalorder %s956_s28, %s956_s28 }
  0x3c   : > { %p959_p8 = pnand %p957_p3, %p917_p9  ;;  %p966_p2 = por %p965_p10, %p964_p5 }
  0x3e   : > { %p960_p4 = pneg %p959_p8 }
  0x40   : > { %p967_p0 = pnand %p966_p2, %p960_p4 }
  0x42   : > { %970 = shalt.err (!%p967_p0)
}
  0x43   : > { %s1075_s17 = smov 128   ;;  %s1076_s19 = smov 8  }
  0x44   : > { %859 = dma.hbm_to_vmem [thread:$0]  (!%p1174_p7), %s1360_s2, 256, %s1184_s5, [#allocation7], %s1075_s17, %s1075_s17, %s1076_s19  }
  0x45   : > { %s738_s4 = sshll.u32 %s156_s27, 6  ;;  %s767_s6 = sshll.u32 %s1071_s15, 10 }
  0x46   : > { %s1241_s9 = scalar_lea.hbm %s1358_s0, %s767_s6  ;;  %s160_s10 = scalar_lea.vmem [#allocation3], %s738_s4 }
  0x47   : > { %s168_s29 = sshll.u32 %s160_s10, 4  ;;  %s1245_s11 = scalar_lea.sflag [#allocation4], %s156_s27  ;;  %s1243_s29 = int_to_ptr.vmem [resolvable:$true] %s168_s29 }
  0x48   : > { %s971_s28 = scalar_lea.hbm %s1241_s9, 1024  ;;  %p1375_p7 = scmp.ne.s32.totalorder %s1374_s30, 0 }
  0x49   : > { %p972_p9 = scmp.ne.s32.totalorder %s1241_s9, %s971_s28  ;;  %s976_s22 = scalar_lea.hbm %s1358_s0, 2048 }
  0x4a   : > { %p973_p1 = pneg %p1375_p7  ;;  %p977_p12 = scmp.lt.u32.totalorder %s1241_s9, %s1358_s0 }
  0x4b   : > { %p978_p13 = scmp.lt.u32.totalorder %s976_s22, %s971_s28  ;;  %p980_p8 = scmp.lt.u32.totalorder %s971_s28, %s1241_s9 }
  0x4c   : > { %p974_p6 = pnand %p973_p1, %p972_p9 }
  0x4d   : > { %p979_p3 = por %p978_p13, %p977_p12 }
  0x4e   : > { %p975_p11 = pneg %p974_p6 }
  0x4f   : > { %p981_p4 = por %p980_p8, %p979_p3 }
  0x51   : > { %p982_p5 = pnand %p981_p4, %p975_p11 }
  0x53   : > { %985 = shalt.err (!%p982_p5)
}
  0x54   : > { %s986_s27 = scalar_lea.vmem %s1243_s29, 1024  ;;  %s1077_s4 = smov [#allocation3]  }
  0x55   : > { %p987_p10 = scmp.ne.s32.totalorder %s1243_s29, %s986_s27  ;;  %s991_s8 = sshll.u32 %s1077_s4, 4  ;;  %s992_s8 = int_to_ptr.vmem [resolvable:$false] %s991_s8 }
  0x56   : > { %s993_s10 = scalar_lea.vmem %s992_s8, 2048  ;;  %p994_p9 = scmp.lt.s32.totalorder %s1243_s29, %s992_s8 }
  0x57   : > { %p989_p2 = pnand %p987_p10, %p973_p1  ;;  %p995_p6 = scmp.lt.s32.totalorder %s993_s10, %s986_s27 }
  0x59   : > { %p990_p0 = pneg %p989_p2  ;;  %p996_p12 = por %p995_p6, %p994_p9 }
  0x5b   : > { %p997_p13 = pnand %p996_p12, %p990_p0 }
  0x5d   : > { %1000 = shalt.err (!%p997_p13)
}
  0x5e   : > { %863 = dma.hbm_to_vmem [thread:$0]  (!%p1375_p7), %s1241_s9, 1024, %s1243_s29, %s1245_s11, %s1075_s17, %s1075_s17, %s1076_s19  }
  0x5f   : > { %p1376_p1 = scmp.ne.s32.totalorder %s1371_s26, 0 }
  0x60   : > { %s1279_s28 = sand.u32 (!%p1376_p1), 1, %s1063_s13   ;;  %p1377_p11 = scmp.ne.s32.totalorder (!%p1376_p1), %s1368_s23, 0 }
  0x61   : > { %180 = sbr.rel (%p1376_p1) target bundleno = 570 (0x23a), region = 32  ;;  %s743_s5 = sshll.u32 (!%p1376_p1), %s1279_s28, 6 }
  0x62   : > { %s183_s20 = scalar_lea.sflag (!%p1376_p1), [#allocation4], %s1279_s28  ;;  %s186_s22 = scalar_lea.vmem (!%p1376_p1), [#allocation3], %s743_s5 }
  0x68   : > { %1046 = dma.done.wait (%p1377_p11), %s183_s20, 1024  }
  0x69   : > { %1048 = vsyncadd (%p1377_p11), %s183_s20, 4294966272  ;;  %p1378_p3 = scmp.eq.s32.totalorder %s1125_s16, 0 }
  0x6b   : > { %1050 = dma.done.wait (%p1378_p3), [#allocation7], 384   ;;  %p1379_p7 = pmov %p1378_p3 }
  0x6c   : > { %v1078_v0 = vmov 0.0|0.0   ;;  %vm1079_vm0 = vmmov 0   ;;  %v1080_v1 = vmov 0.0   ;;  %v220_v2 = vld [vmem:[%s186_s22] sm:$0xff]  ;;  %v221_v3 = vld [vmem:[%s186_s22 + $0x8] sm:$0xff]  ;;  %v748_v5 = vld [vmem:[%s186_s22 + $0x10] sm:$0xff] }
  0x6d   : > { %1052 = vsyncadd (%p1379_p7), [#allocation7], 4294966912  ;;  %825 = vmatprep.subr.bf16.mxu1 %v1078_v0  ;;  %791 = vmatprep.mubr.msk.f32.mxu1 %vm1079_vm0, %v1080_v1  ;;  %v826_v4 = vpack.c.bf16 %v221_v3, %v220_v2  ;;  %v749_v6 = vld [vmem:[%s186_s22 + $0x18] sm:$0xff]  ;;  %v751_v7 = vld [vmem:[%s186_s22 + $0x20] sm:$0xff]  ;;  %vm222_vm1 = vcmask 130048   ;;  %s746_s23 = sshll.u32 %s1279_s28, 5 }
  0x6e   : > { %831 = vmatprep.subr.bf16.mxu0 %v1078_v0  ;;  %805 = vmatprep.mubr.msk.f32.mxu0 %vm1079_vm0, %v1080_v1  ;;  %v752_v8 = vld [vmem:[%s186_s22 + $0x28] sm:$0xff]  ;;  %v219_v9 = vld [vmem:[#allocation6] sm:$0xff]  ;;  %v829_v10 = vpack.c.bf16 %v749_v6, %v748_v5  ;;  %v754_v12 = vld [vmem:[%s186_s22 + $0x30] sm:$0xff]  ;;  %vm622_vm2 = vcmask 64512   ;;  %s216_s26 = scalar_lea.vmem [#allocation9], %s746_s23  ;;  %s768_s17 = sshll.u32 %s1125_s16, 9 }
  0x6f   : > { %827 = vmatpush3.bf16.msra.mxu1 %v826_v4  ;;  %v832_v11 = vpack.c.bf16 %v752_v8, %v751_v7  ;;  %v755_v13 = vld [vmem:[%s186_s22 + $0x38] sm:$0xff]  ;;  %v523_v15 = vld [vmem:[#allocation8] sm:$0xff]  ;;  %v524_v16 = vld [vmem:[#allocation8 + $0x8] sm:$0xff]  ;;  %s641_s30 = sshll.u32 %s216_s26, 4  ;;  %s1314_s29 = scalar_lea.hbm %s1361_s3, %s768_s17  ;;  %s1309_s30 = int_to_ptr.vmem [resolvable:$true] %s641_s30 }
  0x70   : > { %828 = vmatprep.subr.bf16.mxu1 %v1078_v0  ;;  %v835_v14 = vpack.c.bf16 %v755_v13, %v754_v12  ;;  %v837_v17 = vpack.c.bf16 %v524_v16, %v523_v15  ;;  %s628_s11 = scalar_lea.sflag [#allocation5], %s1279_s28  ;;  %s1001_s6 = scalar_lea.vmem %s1309_s30, 512 }
  0x71   : > { %833 = vmatpush3.bf16.msra.mxu0 %v832_v11  ;;  %p1002_p8 = scmp.ne.s32.totalorder %s1309_s30, %s1001_s6  ;;  %p1380_p4 = scmp.ne.s32.totalorder %s1369_s24, 0 }
  0x72   : > { %792 = vmatmul.mubr.msk.f32.vlgmr.msra.gmra.mrb[0].mxu1 %vm222_vm1, %v219_v9  ;;  %838 = vmatprep.subr.bf16.mxu0 %v837_v17  ;;  %s1081_s16 = smov [#allocation9]  }
  0x73   : > { %830 = vmatpush3.bf16.msra.mxu1 %v829_v10  ;;  %798 = vmatprep.mubr.msk.f32.mxu1 %vm1079_vm0, %v1080_v1  ;;  %p1003_p5 = pnand %p1002_p8, %p1380_p4  ;;  %s1005_s7 = sshll.u32 %s1081_s16, 4  ;;  %s1006_s7 = int_to_ptr.vmem [resolvable:$false] %s1005_s7 }
  0x74   : > { %834 = vmatprep.subr.bf16.mxu1 %v1078_v0  ;;  %806 = vmatmul.mubr.msk.f32.vlgmr.msra.gmra.mrb[0].mxu0 %vm222_vm1, %v219_v9  ;;  %s1007_s27 = scalar_lea.vmem %s1006_s7, 1024  ;;  %p1008_p2 = scmp.lt.s32.totalorder %s1309_s30, %s1006_s7 }
  0x75   : > { %840 = vmatpush3.bf16.msra.mxu0 %v837_v17  ;;  %p1004_p10 = pneg %p1003_p5  ;;  %p1009_p0 = scmp.lt.s32.totalorder %s1007_s27, %s1001_s6 }
  0x76   : > { %799 = vmatmul.mubr.msk.f32.vlgmr.msra.gmra.mrb[2].mxu1 %vm222_vm1, %v219_v9 }
  0x77   : > { %836 = vmatpush3.bf16.msra.mxu1 %v835_v14  ;;  %812 = vmatprep.mubr.msk.f32.mxu1 %vm1079_vm0, %v1080_v1  ;;  %p1010_p9 = por %p1009_p0, %p1008_p2 }
  0x79   : > { %p1011_p6 = pnand %p1010_p9, %p1004_p10 }
  0x7a   : > { %813 = vmatmul.mubr.msk.f32.vlgmr.msra.gmra.mrb[4].mxu1 %vm222_vm1, %v219_v9 }
 0x145   : > { %v292_v18 = vpop.f32.mrb[0].mxu1 }
 0x146   : > { %296 = vst.msk [vmem:[#allocation2] sm:$0xff] %vm222_vm1, %v292_v18  ;;  %v793_v19 = vpop.f32.mrb[1].mxu1 }
 0x147   : > { %v440_v20 = vpop.f32.mrb[0].mxu0 }
 0x148   : > { %444 = vst.msk [vmem:[#allocation2 + $0x10] sm:$0xff] %vm222_vm1, %v440_v20  ;;  %v807_v21 = vpop.f32.mrb[1].mxu0 }
 0x149   : > { %v366_v22 = vpop.f32.mrb[2].mxu1 }
 0x14a   : > { %370 = vst.msk [vmem:[#allocation2 + $0x8] sm:$0xff] %vm222_vm1, %v366_v22  ;;  %v800_v23 = vpop.f32.mrb[3].mxu1 }
 0x14d   : > { %v514_v24 = vpop.f32.mrb[4].mxu1  ;;  %v519_v25 = vld [vmem:[#allocation2] sm:$0xff] }
 0x14e   : > { %518 = vst.msk [vmem:[#allocation2 + $0x18] sm:$0xff] %vm222_vm1, %v514_v24  ;;  %v814_v26 = vpop.f32.mrb[5].mxu1  ;;  %819 = vmatprep.mubr.msk.f32.mxu0 %vm222_vm1, %v519_v25 }
 0x14f   : > { %v521_v27 = vld [vmem:[#allocation2 + $0x10] sm:$0xff] }
 0x151   : > { %v520_v28 = vld [vmem:[#allocation2 + $0x8] sm:$0xff] }
 0x152   : > { %820 = vmatmul.mubr.msk.f32.vlgmr.msra.gmra.mrb[2].mxu0 %vm222_vm1, %v520_v28 }
 0x153   : > { %822 = vmatprep.mubr.msk.f32.mxu0 %vm222_vm1, %v521_v27 }
 0x155   : > { %v522_v29 = vld [vmem:[#allocation2 + $0x18] sm:$0xff] }
 0x156   : > { %823 = vmatmul.mubr.msk.f32.gmra.mrb[4].mxu0 %vm222_vm1, %v522_v29 }
 0x225   : > { %v821_v30 = vpop.f32.mrb[2].mxu0 }
 0x226   : > { %624 = vst.msk [vmem:[%s216_s26 + $0x8] sm:$0xff] %vm622_vm2, %v821_v30  ;;  %v603_v31 = vpop.f32.mrb[3].mxu0 }
 0x227   : > { %623 = vst.msk [vmem:[%s216_s26] sm:$0xff] %vm622_vm2, %v603_v31 }
 0x229   : > { %v824_v32 = vpop.f32.mrb[4].mxu0 }
 0x22a   : > { %626 = vst.msk [vmem:[%s216_s26 + $0x18] sm:$0xff] %vm622_vm2, %v824_v32  ;;  %v613_v33 = vpop.f32.mrb[5].mxu0 }
 0x22b   : > { %625 = vst.msk [vmem:[%s216_s26 + $0x10] sm:$0xff] %vm622_vm2, %v613_v33 }
 0x22c   : > { %1014 = shalt.err (!%p1011_p6)
}
 0x22d   : > { %s1015_s4 = scalar_lea.hbm %s1314_s29, 512  ;;  %s1019_s5 = scalar_lea.hbm %s1361_s3, 1024 }
 0x22e   : > { %p1016_p12 = scmp.ne.s32.totalorder %s1314_s29, %s1015_s4  ;;  %p1020_p11 = scmp.lt.u32.totalorder %s1314_s29, %s1361_s3 }
 0x22f   : > { %p1021_p3 = scmp.lt.u32.totalorder %s1019_s5, %s1015_s4  ;;  %p1023_p8 = scmp.lt.u32.totalorder %s1015_s4, %s1314_s29 }
 0x230   : > { %p1017_p13 = pnand %p1016_p12, %p1380_p4 }
 0x231   : > { %p1022_p7 = por %p1021_p3, %p1020_p11 }
 0x232   : > { %p1018_p1 = pneg %p1017_p13 }
 0x233   : > { %p1024_p5 = por %p1023_p8, %p1022_p7 }
 0x235   : > { %p1025_p10 = pnand %p1024_p5, %p1018_p1 }
 0x237   : > { %1028 = shalt.err (!%p1025_p10)
}
 0x238   : > { %s1082_s23 = smov 128   ;;  %s1083_s26 = smov 8  }
 0x239   : > { %851 = dma.vmem_to_hbm [thread:$0]  (%p1380_p4), %s1309_s30, 512, %s1314_s29, %s628_s11, %s1082_s23, %s1082_s23, %s1083_s26  }
 0x23a PF: > { %s656_s17 = sand.u32 1, %s1059_s12   ;;  %p1381_p2 = scmp.ne.s32.totalorder %s1370_s25, 0 }
 0x23b   : > { %p1382_p0 = scmp.ge.s32.totalorder %s1071_s15, 2  ;;  %s657_s19 = scalar_lea.sflag [#allocation5], %s656_s17 }
 0x23d   : > { %p865_p9 = pnand %p1382_p0, %p1381_p2 }
 0x23f   : > { %1054 = dma.done.wait (!%p865_p9), %s657_s19, 512  }
 0x240   : > { %1056 = vsyncadd (!%p865_p9), %s657_s19, 4294966784  ;;  %p17_p6 = scmp.ge.s32.totalorder %s1129_s18, 4   ;;  %s1383_s12 = smov %s1063_s13 }
 0x241   : > { %s1384_s13 = smov %s1067_s14  ;;  %s1385_s14 = smov %s1141_s21 }
 0x242   : > { %s1386_s15 = smov %s1129_s18  ;;  %19 = sbr.rel (!%p17_p6) target bundleno = 6 (0x6), region = 88 }
 0x249   :  { %662 = vsyncpa [#allocation4], 1 }
 0x24a   :  { %664 = vsyncpa [#allocation4 + $0x1], 1 }
 0x24b   :  { %665 = vsyncpa [#allocation7], 1 }
 0x24c   :  { %666 = vsyncpa [#allocation5], 1 }
 0x24d   :  { %668 = vsyncpa [#allocation5 + $0x1], 1 }

</bundles_post_ra>
